<compile_context>
chip_gen: v6e
topology: v6e:2x2x1
jax: 0.10.0
libtpu: 0.0.40
codegen_flags: <defaults>
</compile_context>

<pallas_src>
import functools

import jax
import jax.numpy as jnp
import numpy as np
from jax.experimental import pallas as pl
from jax.experimental.pallas import tpu as pltpu


def _round_up(x, m):
    return (x + m - 1) // m * m


# ----------------------------------------------------------------------------
# One-time probe: determine pltpu.roll's shift direction on the running chip so
# the static gate-alignment shifts are guaranteed correct.
# ----------------------------------------------------------------------------
_ROLL_FLIP = None


def _detect_roll_flip():
    """True iff pltpu.roll(x, s, axis) behaves like jnp.roll(x, -s, axis)."""
    global _ROLL_FLIP
    if _ROLL_FLIP is not None:
        return _ROLL_FLIP

    def probe_kernel(x_ref, o_ref):
        o_ref[...] = pltpu.roll(x_ref[...], 32, 1)

    x = jnp.broadcast_to(jnp.arange(128, dtype=jnp.float32), (8, 128))
    out = pl.pallas_call(
        probe_kernel,
        out_shape=jax.ShapeDtypeStruct((8, 128), jnp.float32),
    )(x)
    v = int(round(float(jax.device_get(out)[0, 0])))
    # jnp.roll semantics: out[0] = x[(0 - 32) % 128] = 96.  Flipped: out[0] = 32.
    _ROLL_FLIP = (v == 32)
    return _ROLL_FLIP


# ----------------------------------------------------------------------------
# Fused Pallas kernel: all LSTM layers + final Linear projection
# ----------------------------------------------------------------------------
def _fused_lstm_block_kernel(*refs, num_layers, seq_len, batch_pad, hidden, shifts):
    """Single-invocation kernel (grid=(1,)).

    refs layout (inputs, outputs, scratch):
      inputs : x (T*BP, Din_pad), h0 (L, BP, 4H), c0 (L, BP, 4H),
               per layer l: w_ih_t (Din_pad_l, 4H), w_hh_t (4H, 4H), b (1, 4H),
               w_proj_t (4H, O_pad), b_proj (1, O_pad)
      outputs: out (T*BP, O_pad), hn (L, BP, 4H), cn (L, BP, 4H)
      scratch: xw_sc (T*BP, 4H) f32, y_sc (T*BP, 4H) f32
    Rows of x / y_sc / out are time-major: row = t * BP + b.
    State h/c is kept full-width (4H lanes); only lanes [0, H) are meaningful, the
    rest multiply zero-padded weight rows so they never contaminate real results.
    """
    T, BP, H, L = seq_len, batch_pad, hidden, num_layers
    shift_f, shift_g, shift_o = shifts
    n_w = 3 * L + 2

    x_ref, h0_ref, c0_ref = refs[0], refs[1], refs[2]
    w_refs = refs[3:3 + n_w]
    out_ref, hn_ref, cn_ref = refs[3 + n_w], refs[4 + n_w], refs[5 + n_w]
    xw_sc, y_sc = refs[6 + n_w], refs[7 + n_w]

    for l in range(L):
        w_ih = w_refs[3 * l][...]                  # (Din_pad_l, 4H) pre-transposed, 0-padded
        w_hh = w_refs[3 * l + 1][...]              # (4H, 4H)        pre-transposed, 0-padded
        b = w_refs[3 * l + 2][...]                 # (1, 4H)         b_ih + b_hh

        src_ref = x_ref if l == 0 else y_sc
        # Hoisted input projection: one big matmul for the whole sequence,
        # off the serial recurrence path.
        xw_sc[...] = (jnp.dot(src_ref[...].astype(jnp.float32), w_ih,
                              preferred_element_type=jnp.float32) + b)

        h = h0_ref[l].astype(jnp.float32)          # (BP, 4H), true h in lanes [0, H)
        c = c0_ref[l].astype(jnp.float32)          # (BP, 4H), true c in lanes [0, H)

        for t in range(T):                         # T small & static -> fully unrolled
            gates = xw_sc[t * BP:(t + 1) * BP, :] + jnp.dot(
                h, w_hh, preferred_element_type=jnp.float32)       # (BP, 4H) = (8, 128)
            # Full-vreg transcendentals (EUP), then XLU rolls to align f/g/o with lanes
            # [0, H) where c/h live.  Lanes >= H carry bounded garbage; harmless.
            sig = jax.nn.sigmoid(gates)            # i @ [0,H), f @ [H,2H), o @ [3H,4H)
            tnh = jnp.tanh(gates)                  # g @ [2H,3H)
            i_al = sig
            f_al = pltpu.roll(sig, shift_f, 1)
            g_al = pltpu.roll(tnh, shift_g, 1)
            o_al = pltpu.roll(sig, shift_o, 1)
            c = f_al * c + i_al * g_al             # full-vreg VPU
            h = o_al * jnp.tanh(c)
            y_sc[t * BP:(t + 1) * BP, :] = h       # aligned (8, 128) store

        # Final state written once per layer (lane-dense; sliced to H in the wrapper).
        hn_ref[l] = h.astype(hn_ref.dtype)
        cn_ref[l] = c.astype(cn_ref.dtype)

    # Fused output projection; zero-padded weights make the garbage lanes of y_sc inert
    # and the store lane-dense (O padded to a multiple of 128).
    w_proj = w_refs[3 * L][...]                    # (4H, O_pad)
    b_proj = w_refs[3 * L + 1][...]                # (1, O_pad)
    out_ref[...] = (jnp.dot(y_sc[...], w_proj, preferred_element_type=jnp.float32)
                    + b_proj).astype(out_ref.dtype)


def _full_spec(shape):
    nd = len(shape)
    return pl.BlockSpec(tuple(shape), lambda i, _nd=nd: (0,) * _nd)


@functools.partial(jax.jit, static_argnames=("out_dim", "roll_flip"))
def lstm_block_forward(embeds, h0, c0, layer_weights, proj_weights, out_dim, roll_flip):
    """embeds: (B, T, Din). h0/c0: (L, B, H). layer_weights: per layer
    (w_ih_t (Din_pad,4H), w_hh_t (4H,4H), b (1,4H)), zero-padded; proj_weights:
    (w_proj_t (4H,O_pad), b_proj (1,O_pad)). Returns out (B,T,O), hn/cn (L,B,H)."""
    B, T, Din = embeds.shape
    L = len(layer_weights)
    G = layer_weights[0][1].shape[1]               # 4H
    H = G // 4
    Din_pad = layer_weights[0][0].shape[0]
    O_pad = proj_weights[0].shape[1]
    BP = _round_up(max(B, 1), 8)                   # batch padded to a sublane multiple
    dtype = embeds.dtype

    # Static lane shifts that bring f/g/o to lanes [0, H), matching the probed
    # direction of pltpu.roll.
    shifts = (H, 2 * H, 3 * H) if roll_flip else (3 * H, 2 * H, H)

    # Time-major, batch- and feature-padded rows: row = t * BP + b.
    x = jnp.transpose(embeds, (1, 0, 2))
    x = jnp.pad(x, ((0, 0), (0, BP - B), (0, Din_pad - Din))).reshape(T * BP, Din_pad)

    h0p = jnp.pad(h0, ((0, 0), (0, BP - B), (0, G - H))).astype(dtype)
    c0p = jnp.pad(c0, ((0, 0), (0, BP - B), (0, G - H))).astype(dtype)

    flat_w = []
    for (w_ih_t, w_hh_t, b) in layer_weights:
        flat_w += [w_ih_t, w_hh_t, b]
    flat_w += list(proj_weights)

    kernel = functools.partial(_fused_lstm_block_kernel, num_layers=L, seq_len=T,
                               batch_pad=BP, hidden=H, shifts=shifts)

    in_specs = ([_full_spec((T * BP, Din_pad)),
                 _full_spec((L, BP, G)),
                 _full_spec((L, BP, G))]
                + [_full_spec(w.shape) for w in flat_w])
    out_specs = [_full_spec((T * BP, O_pad)),
                 _full_spec((L, BP, G)),
                 _full_spec((L, BP, G))]

    out_pad, hn_pad, cn_pad = pl.pallas_call(
        kernel,
        out_shape=(jax.ShapeDtypeStruct((T * BP, O_pad), dtype),
                   jax.ShapeDtypeStruct((L, BP, G), dtype),
                   jax.ShapeDtypeStruct((L, BP, G), dtype)),
        grid_spec=pltpu.PrefetchScalarGridSpec(
            num_scalar_prefetch=0,
            grid=(1,),
            in_specs=in_specs,
            out_specs=out_specs,
            scratch_shapes=[pltpu.VMEM((T * BP, G), jnp.float32),   # hoisted gate preacts
                            pltpu.VMEM((T * BP, G), jnp.float32)],  # inter-layer activations
        ),
        compiler_params=pltpu.CompilerParams(
            dimension_semantics=("arbitrary",)),
    )(x, h0p, c0p, *flat_w)

    out = out_pad.reshape(T, BP, O_pad)[:, :B, :out_dim].transpose(1, 0, 2)
    hn = hn_pad[:, :B, :H]
    cn = cn_pad[:, :B, :H]
    return out, hn, cn


# ----------------------------------------------------------------------------
# LSTMBlock in JAX (parameter setup + thin wrapper around the fused kernel)
# ----------------------------------------------------------------------------
class LSTMBlockPallas:
    def __init__(self, *, input_size, hidden_size, num_lstm_layer, output_size, key):
        self.input_size = input_size
        self.hidden_size = hidden_size
        self.num_layers = num_lstm_layer
        self.output_size = output_size

        H = hidden_size
        G = 4 * H
        k = 1.0 / np.sqrt(H)           # PyTorch default uniform(-1/sqrt(H), 1/sqrt(H))
        keys = jax.random.split(key, 4 * num_lstm_layer + 2)

        # Raw PyTorch-layout parameters (kept for the pure-JAX reference check).
        self.layers = []
        ki = 0
        for l in range(num_lstm_layer):
            din = input_size if l == 0 else H
            w_ih = jax.random.uniform(keys[ki + 0], (G, din), jnp.float32, -k, k)
            w_hh = jax.random.uniform(keys[ki + 1], (G, H), jnp.float32, -k, k)
            b_ih = jax.random.uniform(keys[ki + 2], (G,), jnp.float32, -k, k)
            b_hh = jax.random.uniform(keys[ki + 3], (G,), jnp.float32, -k, k)
            ki += 4
            self.layers.append((w_ih, w_hh, b_ih, b_hh))

        self.w_proj = jax.random.uniform(keys[ki + 0], (output_size, H), jnp.float32, -k, k)
        self.b_proj = jax.random.uniform(keys[ki + 1], (output_size,), jnp.float32, -k, k)

        # Kernel-layout parameters: transposed, bias-fused and ZERO-PADDED once here:
        #   * layer-0 W_ih rows padded to a lane multiple (lane-dense hoisted matmul),
        #   * layer>0 W_ih and all W_hh padded to (4H, 4H) so full-width (garbage-lane)
        #     activations multiply exact zeros,
        #   * projection padded to (4H, O_pad) with O_pad a multiple of 128 so the
        #     kernel's output store is lane-dense (unmasked vst).
        din0_pad = _round_up(input_size, 128)
        lw = []
        for l, (w_ih, w_hh, b_ih, b_hh) in enumerate(self.layers):
            din = input_size if l == 0 else H
            din_pad = din0_pad if l == 0 else G
            w_ih_t = jnp.zeros((din_pad, G), jnp.float32).at[:din, :].set(jnp.transpose(w_ih))
            w_hh_t = jnp.zeros((G, G), jnp.float32).at[:H, :].set(jnp.transpose(w_hh))
            b = (b_ih + b_hh).reshape(1, G)
            lw.append((w_ih_t, w_hh_t, b))
        self.layer_weights = tuple(lw)

        o_pad = _round_up(output_size, 128)
        w_proj_t = (jnp.zeros((G, o_pad), jnp.float32)
                    .at[:H, :output_size].set(jnp.transpose(self.w_proj)))
        b_proj_p = jnp.zeros((1, o_pad), jnp.float32).at[0, :output_size].set(self.b_proj)
        self.proj_weights = (w_proj_t, b_proj_p)

        # One-time hardware probe for pltpu.roll's shift direction (static thereafter).
        self._roll_flip = _detect_roll_flip()

    def __call__(self, embeds, previous_block_hn=None, previous_block_cn=None):
        B, T, _ = embeds.shape
        L, H = self.num_layers, self.hidden_size
        if previous_block_hn is None and previous_block_cn is None:
            h0 = jnp.zeros((L, B, H), embeds.dtype)
            c0 = jnp.zeros((L, B, H), embeds.dtype)
        else:
            h0, c0 = previous_block_hn, previous_block_cn

        out, hn, cn = lstm_block_forward(embeds, h0, c0,
                                         self.layer_weights, self.proj_weights,
                                         out_dim=self.output_size,
                                         roll_flip=self._roll_flip)
        return out, (hn, cn)


# ----------------------------------------------------------------------------
# Pure-JAX reference (PyTorch nn.LSTM semantics) for validation
# ----------------------------------------------------------------------------
def reference_forward(block: LSTMBlockPallas, embeds, h0, c0):
    H = block.hidden_size
    x = embeds  # (B, T, Din)
    hns, cns = [], []
    for l, (w_ih, w_hh, b_ih, b_hh) in enumerate(block.layers):
        h, c = h0[l], c0[l]
        ys = []
        for t in range(x.shape[1]):
            gates = x[:, t] @ w_ih.T + b_ih + h @ w_hh.T + b_hh
            i = jax.nn.sigmoid(gates[:, 0 * H:1 * H])
            f = jax.nn.sigmoid(gates[:, 1 * H:2 * H])
            g = jnp.tanh(gates[:, 2 * H:3 * H])
            o = jax.nn.sigmoid(gates[:, 3 * H:4 * H])
            c = f * c + i * g
            h = o * jnp.tanh(c)
            ys.append(h)
        x = jnp.stack(ys, axis=1)
        hns.append(h)
        cns.append(c)
    out = x @ block.w_proj.T + block.b_proj
    return out, jnp.stack(hns, axis=0), jnp.stack(cns, axis=0)


# ----------------------------------------------------------------------------
if __name__ == "__main__":
    # Small shapes consistent with the module (hidden_size -> 32, num_lstm_layer = 4).
    B, T = 2, 8
    INPUT_SIZE, HIDDEN, NUM_LAYERS, OUTPUT_SIZE = 48, 32, 4, 40

    key = jax.random.PRNGKey(0)
    k_params, k_x, k_h, k_c = jax.random.split(key, 4)

    block = LSTMBlockPallas(input_size=INPUT_SIZE, hidden_size=HIDDEN,
                            num_lstm_layer=NUM_LAYERS, output_size=OUTPUT_SIZE,
                            key=k_params)

    embeds = jax.random.normal(k_x, (B, T, INPUT_SIZE), jnp.float32)

    # --- Case 1: no previous block state (== PyTorch zero init) ---------------
    out, (hn, cn) = block(embeds)
    out = jax.block_until_ready(out)
    hn = jax.block_until_ready(hn)
    cn = jax.block_until_ready(cn)

    z = jnp.zeros((NUM_LAYERS, B, HIDDEN), jnp.float32)
    ref_out, ref_hn, ref_cn = reference_forward(block, embeds, z, z)
    np.testing.assert_allclose(np.asarray(out), np.asarray(ref_out), rtol=1e-5, atol=1e-5)
    np.testing.assert_allclose(np.asarray(hn), np.asarray(ref_hn), rtol=1e-5, atol=1e-5)
    np.testing.assert_allclose(np.asarray(cn), np.asarray(ref_cn), rtol=1e-5, atol=1e-5)
    assert out.shape == (B, T, OUTPUT_SIZE)
    assert hn.shape == (NUM_LAYERS, B, HIDDEN) and cn.shape == (NUM_LAYERS, B, HIDDEN)

    # --- Case 2: carried-in previous block state -------------------------------
    h_prev = 0.1 * jax.random.normal(k_h, (NUM_LAYERS, B, HIDDEN), jnp.float32)
    c_prev = 0.1 * jax.random.normal(k_c, (NUM_LAYERS, B, HIDDEN), jnp.float32)
    out2, (hn2, cn2) = block(embeds, h_prev, c_prev)
    out2 = jax.block_until_ready(out2)
    ref_out2, ref_hn2, ref_cn2 = reference_forward(block, embeds, h_prev, c_prev)
    np.testing.assert_allclose(np.asarray(out2), np.asarray(ref_out2), rtol=1e-5, atol=1e-5)
    np.testing.assert_allclose(np.asarray(hn2), np.asarray(ref_hn2), rtol=1e-5, atol=1e-5)
    np.testing.assert_allclose(np.asarray(cn2), np.asarray(ref_cn2), rtol=1e-5, atol=1e-5)

    print("KERNEL_OK")
</pallas_src>

<mosaic_0001>
module attributes {stable_mosaic.version = 11 : i64} {
  func.func @probe_kernel(%arg0: memref<8x128xf32, #tpu.memory_space<vmem>>, %arg1: memref<8x128xf32, #tpu.memory_space<vmem>>) attributes {dimension_semantics = [], scalar_prefetch = 0 : i64, scratch_operands = 0 : i64, tpu.core_type = #tpu.core_type<tc>} {
    %c0 = arith.constant 0 : index
    %c0_0 = arith.constant 0 : index
    %0 = vector.load %arg0[%c0, %c0_0] : memref<8x128xf32, #tpu.memory_space<vmem>>, vector<8x128xf32>
    %c32_i32 = arith.constant 32 : i32
    %1 = tpu.dynamic_rotate %0 by %c32_i32 dim 1 : vector<8x128xf32>, i32 -> vector<8x128xf32>
    %c0_1 = arith.constant 0 : index
    %c0_2 = arith.constant 0 : index
    %2 = vector.load %arg1[%c0_1, %c0_2] : memref<8x128xf32, #tpu.memory_space<vmem>>, vector<8x128xf32>
    tpu.vector_store %arg1[%c0_1, %c0_2], %1 {strides = array<i32>} : memref<8x128xf32, #tpu.memory_space<vmem>>, vector<8x128xf32>,
    return
  }
}

</mosaic_0001>

<bundles_post_ra>
// kernel: tpu_custom_call.1
= control target key start
LH: loop header
LB: loop body
LE: loop exit
PB: predicated region body
PF: predicated region fallthrough
CT: control target
= control target key end

     0   :  { %6 = vsyncpa [#allocation3], 0  ;;  %s106_s0 = inlined_call_operand.hbm [shape: f32[8,128], index: 0, kind: input, shape index: {}]   ;;  %s107_s1 = inlined_call_operand.hbm [shape: f32[8,128], index: 1, kind: output, shape index: {}]  }
   0x1   :  { %7 = vsyncpa [#allocation4], 0  ;;  %s87_s6 = smov [#allocation2]  }
   0x2   :  { %s14_s7 = sshll.u32 %s87_s6, 4  ;;  %s15_s7 = int_to_ptr.vmem [resolvable:$true] %s14_s7 }
   0x3   :  { %s51_s8 = scalar_lea.vmem %s15_s7, 128  ;;  %p56_p1 = scmp.lt.s32.totalorder %s15_s7, %s15_s7 }
   0x4   :  { %p52_p0 = scmp.ne.s32.totalorder %s15_s7, %s51_s8  ;;  %p57_p2 = scmp.lt.s32.totalorder %s51_s8, %s51_s8 }
   0x6   :  { %p58_p3 = por %p57_p2, %p56_p1 }
   0x8   :  { %p59_p4 = pnand %p58_p3, %p52_p0 }
   0xa   :  { %62 = shalt.err (!%p59_p4)
}
   0xb   :  { %17 = dma.hbm_to_vmem [thread:$0]  %s106_s0, 128, %s15_s7, [#allocation3]  }
   0xc   :  { %83 = dma.done.wait [#allocation3], 128  }
   0xd   :  { %84 = vsyncadd [#allocation3], 4294967168  ;;  %v21_v0 = vld [vmem:[#allocation2] sm:$0xff]  ;;  %s88_s11 = smov 32   ;;  %s89_s12 = smov [#allocation5]  }
   0xe   :  { %22 = vrot.lane.b32.xlu0 %v21_v0, %s88_s11  ;;  %s31_s13 = sshll.u32 %s89_s12, 4  ;;  %s32_s13 = int_to_ptr.vmem [resolvable:$true] %s31_s13 }
   0xf   :  { %s63_s14 = scalar_lea.vmem %s32_s13, 128  ;;  %p68_p6 = scmp.lt.s32.totalorder %s32_s13, %s32_s13 }
  0x10   :  { %p64_p5 = scmp.ne.s32.totalorder %s32_s13, %s63_s14  ;;  %p69_p7 = scmp.lt.s32.totalorder %s63_s14, %s63_s14 }
  0x12   :  { %p70_p8 = por %p69_p7, %p68_p6 }
  0x14   :  { %p71_p9 = pnand %p70_p8, %p64_p5 }
  0x80   :  { %v23_v1 = vpop.permute.xlu0 %22 }
  0x81   :  { %24 = vst [vmem:[#allocation5] sm:$0xff] %v23_v1 }
  0x82   :  { %74 = shalt.err (!%p71_p9)
}
  0x83   :  { %34 = dma.vmem_to_hbm [thread:$0]  %s32_s13, 128, %s107_s1, [#allocation4]  }
  0x84   :  { %85 = dma.done.wait [#allocation4], 128  }
  0x85   :  { %86 = vsyncadd [#allocation4], 4294967168 }
  0x86   :  { %38 = vsyncpa [#allocation3], 1 }
  0x87   :  { %39 = vsyncpa [#allocation4], 1 }

</bundles_post_ra>
